<compile_context>
chip_gen: v6e
topology: v6e:2x2x1
jax: 0.10.0
libtpu: 0.0.40
codegen_flags: <defaults>
</compile_context>

<pallas_src>
import jax
import jax.numpy as jnp
from jax import lax
from jax.experimental import pallas as pl
from jax.experimental.pallas import tpu as pltpu


def _round_up(x, m):
    return (x + m - 1) // m * m


# ----------------------------- Encoder recurrence kernel -----------------------------
def _encoder_kernel(ns_ref, len_ref, gi_ref, whh_ref, bhh_ref, h_out_ref, h_scr):
    # ns_ref: SMEM (1,) int32   -> number of timesteps actually run (max length)
    # len_ref: [Bp,1] int32     -> per-row lengths (freeze hidden past length)
    # gi_ref: [T,Bp,3H] f32     -> precomputed x@W_ih + b_ih, gate order (r,z,n)
    H = h_out_ref.shape[1]
    w_hh = whh_ref[...]
    b_hh = bhh_ref[...]
    lens = len_ref[...]
    h_scr[...] = jnp.zeros_like(h_scr)

    @pl.loop(0, ns_ref[0])
    def _(t):
        h = h_scr[...]
        gi = gi_ref[t]                                               # [Bp, 3H]
        gh = jnp.dot(h, w_hh, preferred_element_type=jnp.float32) + b_hh
        rz = jax.nn.sigmoid(gi[:, :2 * H] + gh[:, :2 * H])           # fused r,z
        z = rz[:, H:]
        n = jnp.tanh(gi[:, 2 * H:] + rz[:, :H] * gh[:, 2 * H:])
        h_new = (1.0 - z) * n + z * h
        h_scr[...] = jnp.where(lens > t, h_new, h)                   # pack_padded: freeze

    h_out_ref[...] = h_scr[...]


def encoder_gru(nsteps, lengths2d, gi_tm, w_hh, b_hh):
    T, Bp, G = gi_tm.shape
    H = w_hh.shape[0]
    return pl.pallas_call(
        _encoder_kernel,
        out_shape=jax.ShapeDtypeStruct((Bp, H), jnp.float32),
        grid_spec=pltpu.PrefetchScalarGridSpec(
            num_scalar_prefetch=1,
            grid=(1,),
            in_specs=[
                pl.BlockSpec((Bp, 1), lambda i, ns: (0, 0)),
                pl.BlockSpec((T, Bp, G), lambda i, ns: (0, 0, 0)),
                pl.BlockSpec((H, G), lambda i, ns: (0, 0)),
                pl.BlockSpec((1, G), lambda i, ns: (0, 0)),
            ],
            out_specs=pl.BlockSpec((Bp, H), lambda i, ns: (0, 0)),
            scratch_shapes=[pltpu.VMEM((Bp, H), jnp.float32)],
        ),
        compiler_params=pltpu.CompilerParams(dimension_semantics=("arbitrary",)),
    )(nsteps, lengths2d, gi_tm, w_hh, b_hh)


# ----------------------------- Decoder recurrence kernel -----------------------------
def _decoder_kernel(ns_ref, len_ref, h0_ref, gi_ref, whh_ref, bhh_ref, hseq_ref, h_scr):
    # Emits the GRU hidden sequence [T,Bp,H]; positions t >= length are zero-filled
    # (pad_packed_sequence semantics). The vocab projection happens in a later kernel.
    H = h0_ref.shape[1]
    w_hh = whh_ref[...]
    b_hh = bhh_ref[...]
    lens = len_ref[...]
    hseq_ref[...] = jnp.zeros_like(hseq_ref)
    h_scr[...] = h0_ref[...]

    @pl.loop(0, ns_ref[0])
    def _(t):
        h = h_scr[...]
        gi = gi_ref[t]                                               # [Bp, 3H]
        gh = jnp.dot(h, w_hh, preferred_element_type=jnp.float32) + b_hh
        rz = jax.nn.sigmoid(gi[:, :2 * H] + gh[:, :2 * H])
        z = rz[:, H:]
        n = jnp.tanh(gi[:, 2 * H:] + rz[:, :H] * gh[:, 2 * H:])
        h_new = (1.0 - z) * n + z * h
        mask = lens > t
        hseq_ref[t] = jnp.where(mask, h_new, 0.0)                    # zero-fill past length
        h_scr[...] = jnp.where(mask, h_new, h)

    # carried hidden (decoder's returned hidden) is discarded by the top-level module


def decoder_gru(nsteps, lengths2d, h0, gi_tm, w_hh, b_hh):
    T, Bp, G = gi_tm.shape
    H = w_hh.shape[0]
    return pl.pallas_call(
        _decoder_kernel,
        out_shape=jax.ShapeDtypeStruct((T, Bp, H), jnp.float32),
        grid_spec=pltpu.PrefetchScalarGridSpec(
            num_scalar_prefetch=1,
            grid=(1,),
            in_specs=[
                pl.BlockSpec((Bp, 1), lambda i, ns: (0, 0)),
                pl.BlockSpec((Bp, H), lambda i, ns: (0, 0)),
                pl.BlockSpec((T, Bp, G), lambda i, ns: (0, 0, 0)),
                pl.BlockSpec((H, G), lambda i, ns: (0, 0)),
                pl.BlockSpec((1, G), lambda i, ns: (0, 0)),
            ],
            out_specs=pl.BlockSpec((T, Bp, H), lambda i, ns: (0, 0, 0)),
            scratch_shapes=[pltpu.VMEM((Bp, H), jnp.float32)],
        ),
        compiler_params=pltpu.CompilerParams(dimension_semantics=("arbitrary",)),
    )(nsteps, lengths2d, h0, gi_tm, w_hh, b_hh)


# ----------------------------- Batched projection + log_softmax kernel -----------------------------
def _proj_kernel(h_ref, w_ref, b_ref, o_ref):
    logits = jnp.dot(h_ref[...], w_ref[...],
                     preferred_element_type=jnp.float32) + b_ref[...]
    o_ref[...] = jax.nn.log_softmax(logits, axis=-1)


def project_log_softmax(h_flat, w_out, b_out):
    """h_flat: [rows, H] -> log-probs [rows, V] with one lane-dense batched matmul."""
    rows, H = h_flat.shape
    V = w_out.shape[1]
    Vp = _round_up(V, 128)                       # lane-dense output store
    tm = 256 if rows >= 256 else _round_up(rows, 8)
    rows_p = _round_up(rows, tm)
    h_p = jnp.pad(h_flat, ((0, rows_p - rows), (0, 0)))
    w_p = jnp.pad(w_out, ((0, 0), (0, Vp - V)))
    # padded vocab lanes get a -1e30 bias so they contribute 0 to the softmax sum
    b_p = jnp.pad(b_out, ((0, 0), (0, Vp - V)), constant_values=-1e30)

    out = pl.pallas_call(
        _proj_kernel,
        out_shape=jax.ShapeDtypeStruct((rows_p, Vp), jnp.float32),
        grid=(rows_p // tm,),
        in_specs=[
            pl.BlockSpec((tm, H), lambda i: (i, 0)),
            pl.BlockSpec((H, Vp), lambda i: (0, 0)),
            pl.BlockSpec((1, Vp), lambda i: (0, 0)),
        ],
        out_specs=pl.BlockSpec((tm, Vp), lambda i: (i, 0)),
        compiler_params=pltpu.CompilerParams(dimension_semantics=("parallel",)),
    )(h_p, w_p, b_p)
    return out[:rows, :V]


# ----------------------------- Full model forward -----------------------------
def seq2seq_gru_forward(params, enData, enLength, cnData, cnLength):
    B, T_en = enData.shape
    _, T_cn = cnData.shape
    H = params["enc_w_hh"].shape[0]
    V = params["dec_w_out"].shape[1]

    # pad batch to a sublane multiple; padded rows get length 0 and are sliced off
    Bp = _round_up(B, 8)
    pb = Bp - B
    enD = jnp.pad(enData, ((0, pb), (0, 0)))
    cnD = jnp.pad(cnData, ((0, pb), (0, 0)))
    enL = jnp.pad(enLength.astype(jnp.int32), (0, pb))
    cnL = jnp.pad(cnLength.astype(jnp.int32), (0, pb))

    # ---- encoder: time-major embedding gather + batched input-gate precompute ----
    en_emb_tm = jnp.take(params["en_embed"], enD.T, axis=0)            # [Ten,Bp,E]
    gi_en = jnp.einsum("tbe,eg->tbg", en_emb_tm, params["enc_w_ih"],
                       preferred_element_type=jnp.float32) + params["enc_b_ih"]
    ns_en = jnp.minimum(jnp.max(enL), T_en).astype(jnp.int32).reshape(1)
    hidden = encoder_gru(ns_en, enL.reshape(Bp, 1), gi_en,
                         params["enc_w_hh"], params["enc_b_hh"])        # [Bp,H]

    # ---- decoder recurrence (emits hidden sequence only) ----
    cn_emb_tm = jnp.take(params["cn_embed"], cnD.T, axis=0)             # [Tcn,Bp,E]
    gi_cn = jnp.einsum("tbe,eg->tbg", cn_emb_tm, params["dec_w_ih"],
                       preferred_element_type=jnp.float32) + params["dec_b_ih"]
    ns_cn = jnp.minimum(jnp.max(cnL), T_cn).astype(jnp.int32).reshape(1)
    hseq = decoder_gru(ns_cn, cnL.reshape(Bp, 1), hidden, gi_cn,
                       params["dec_w_hh"], params["dec_b_hh"])          # [Tcn,Bp,H]

    # ---- batched, lane-dense vocab projection + log_softmax (batch-first output) ----
    h_bt = jnp.transpose(hseq, (1, 0, 2)).reshape(Bp * T_cn, H)         # small [T,Bp,H] slab
    logp = project_log_softmax(h_bt, params["dec_w_out"], params["dec_b_out"])
    return logp.reshape(Bp, T_cn, V)[:B]                                # [B,Tcn,V]


def init_params(key, en_vocab, cn_vocab, embed_dim, hidden):
    ks = jax.random.split(key, 12)
    s = 0.1
    return {
        "en_embed":  s * jax.random.normal(ks[0], (en_vocab, embed_dim), jnp.float32),
        "cn_embed":  s * jax.random.normal(ks[1], (cn_vocab, embed_dim), jnp.float32),
        # GRU weights pre-transposed to [in, 3H], gate order (r, z, n) like PyTorch
        "enc_w_ih":  s * jax.random.normal(ks[2], (embed_dim, 3 * hidden), jnp.float32),
        "enc_w_hh":  s * jax.random.normal(ks[3], (hidden, 3 * hidden), jnp.float32),
        "enc_b_ih":  s * jax.random.normal(ks[4], (1, 3 * hidden), jnp.float32),
        "enc_b_hh":  s * jax.random.normal(ks[5], (1, 3 * hidden), jnp.float32),
        "dec_w_ih":  s * jax.random.normal(ks[6], (embed_dim, 3 * hidden), jnp.float32),
        "dec_w_hh":  s * jax.random.normal(ks[7], (hidden, 3 * hidden), jnp.float32),
        "dec_b_ih":  s * jax.random.normal(ks[8], (1, 3 * hidden), jnp.float32),
        "dec_b_hh":  s * jax.random.normal(ks[9], (1, 3 * hidden), jnp.float32),
        "dec_w_out": s * jax.random.normal(ks[10], (hidden, cn_vocab), jnp.float32),
        "dec_b_out": s * jax.random.normal(ks[11], (1, cn_vocab), jnp.float32),
    }


if __name__ == "__main__":
    B, T_EN, T_CN = 2, 8, 8
    EN_VOCAB, CN_VOCAB = 50, 40
    EMBED, HIDDEN = 16, 32

    key = jax.random.PRNGKey(0)
    k_param, k_en, k_cn = jax.random.split(key, 3)
    params = init_params(k_param, EN_VOCAB, CN_VOCAB, EMBED, HIDDEN)

    enData = jax.random.randint(k_en, (B, T_EN), 0, EN_VOCAB, dtype=jnp.int32)
    cnData = jax.random.randint(k_cn, (B, T_CN), 0, CN_VOCAB, dtype=jnp.int32)
    enLength = jnp.array([T_EN, 5], dtype=jnp.int32)
    cnLength = jnp.array([T_CN, 6], dtype=jnp.int32)

    fwd = jax.jit(seq2seq_gru_forward)
    out = fwd(params, enData, enLength, cnData, cnLength)
    out = jax.block_until_ready(out)

    assert out.shape == (B, T_CN, CN_VOCAB), out.shape
    assert bool(jnp.all(jnp.isfinite(out)))
    # log_softmax rows should sum (in prob space) to ~1
    assert bool(jnp.allclose(jnp.sum(jnp.exp(out), axis=-1), 1.0, atol=1e-4))
    print("KERNEL_OK")
</pallas_src>

<mosaic_0001>
module attributes {stable_mosaic.version = 11 : i64} {
  func.func @_encoder_kernel(%arg0: i32, %arg1: memref<1xi32, #tpu.memory_space<smem>>, %arg2: memref<8x1xi32, #tpu.memory_space<vmem>>, %arg3: memref<8x8x96xf32, #tpu.memory_space<vmem>>, %arg4: memref<32x96xf32, #tpu.memory_space<vmem>>, %arg5: memref<1x96xf32, #tpu.memory_space<vmem>>, %arg6: memref<8x32xf32, #tpu.memory_space<vmem>>, %arg7: memref<8x32xf32, #tpu.memory_space<vmem>>) attributes {dimension_semantics = [#tpu.dimension_semantics<arbitrary>], iteration_bounds = array<i64: 1>, scalar_prefetch = 1 : i64, scratch_operands = 1 : i64, tpu.core_type = #tpu.core_type<tc>, window_params = [{pipeline_mode = #tpu.pipeline_mode<synchronous>, transform_indices = @transform_0, window_bounds = array<i64: 8, 1>}, {pipeline_mode = #tpu.pipeline_mode<synchronous>, transform_indices = @transform_1, window_bounds = array<i64: 8, 8, 96>}, {pipeline_mode = #tpu.pipeline_mode<synchronous>, transform_indices = @transform_2, window_bounds = array<i64: 32, 96>}, {pipeline_mode = #tpu.pipeline_mode<synchronous>, transform_indices = @transform_3, window_bounds = array<i64: 1, 96>}, {pipeline_mode = #tpu.pipeline_mode<synchronous>, transform_indices = @transform_4, window_bounds = array<i64: 8, 32>}]} {
    %c0 = arith.constant 0 : index
    %c0_0 = arith.constant 0 : index
    %0 = vector.load %arg4[%c0, %c0_0] : memref<32x96xf32, #tpu.memory_space<vmem>>, vector<32x96xf32>
    %c0_1 = arith.constant 0 : index
    %c0_2 = arith.constant 0 : index
    %1 = vector.load %arg5[%c0_1, %c0_2] : memref<1x96xf32, #tpu.memory_space<vmem>>, vector<1x96xf32>
    %c0_3 = arith.constant 0 : index
    %c0_4 = arith.constant 0 : index
    %2 = vector.load %arg2[%c0_3, %c0_4] : memref<8x1xi32, #tpu.memory_space<vmem>>, vector<8x1xi32>
    %cst = arith.constant 0.000000e+00 : f32
    %3 = vector.broadcast %cst : f32 to vector<8x32xf32>
    %c0_5 = arith.constant 0 : index
    %c0_6 = arith.constant 0 : index
    %4 = vector.load %arg7[%c0_5, %c0_6] : memref<8x32xf32, #tpu.memory_space<vmem>>, vector<8x32xf32>
    tpu.vector_store %arg7[%c0_5, %c0_6], %3 {strides = array<i32>} : memref<8x32xf32, #tpu.memory_space<vmem>>, vector<8x32xf32>,
    %c0_7 = arith.constant 0 : index
    %5 = memref.load %arg1[%c0_7] : memref<1xi32, #tpu.memory_space<smem>>
    %c0_i32 = arith.constant 0 : i32
    %6 = arith.subi %5, %c0_i32 : i32
    %c1_i32 = arith.constant 1 : i32
    %c1_i32_8 = arith.constant 1 : i32
    %7 = arith.subi %c1_i32, %c1_i32_8 : i32
    %8 = arith.addi %6, %7 : i32
    %c1_i32_9 = arith.constant 1 : i32
    %9 = arith.divsi %8, %c1_i32_9 : i32
    %c1_i32_10 = arith.constant 1 : i32
    %c0_i32_11 = arith.constant 0 : i32
    %c0_i32_12 = arith.constant 0 : i32
    %10 = arith.subi %9, %c0_i32_12 : i32
    %11 = arith.addi %c0_i32_12, %10 : i32
    %c1_i32_13 = arith.constant 1 : i32
    scf.for %arg8 = %c0_i32_12 to %11 step %c1_i32_13  : i32 {
      %14 = arith.muli %arg8, %c1_i32_10 : i32
      %15 = arith.addi %c0_i32_11, %14 : i32
      %c0_18 = arith.constant 0 : index
      %c0_19 = arith.constant 0 : index
      %16 = vector.load %arg7[%c0_18, %c0_19] : memref<8x32xf32, #tpu.memory_space<vmem>>, vector<8x32xf32>
      %17 = arith.index_cast %15 : i32 to index
      %c0_20 = arith.constant 0 : index
      %c0_21 = arith.constant 0 : index
      %18 = vector.load %arg3[%17, %c0_20, %c0_21] : memref<8x8x96xf32, #tpu.memory_space<vmem>>, vector<1x8x96xf32>
      %19 = vector.shape_cast %18 : vector<1x8x96xf32> to vector<8x96xf32>
      %cst_22 = arith.constant dense<0.000000e+00> : vector<8x96xf32>
      %20 = tpu.matmul %16, %0, %cst_22 {dimension_numbers = #tpu.dot_dimension_numbers<[1], [0], [0], [1], [0, 0, 1, 1], [], []>} : vector<8x32xf32>, vector<32x96xf32>, vector<8x96xf32> -> vector<8x96xf32>
      %21 = vector.broadcast %1 : vector<1x96xf32> to vector<8x96xf32>
      %22 = arith.addf %20, %21 : vector<8x96xf32>
      %23 = vector.extract_strided_slice %19 {offsets = [0, 0], sizes = [8, 64], strides = [1, 1]} : vector<8x96xf32> to vector<8x64xf32>
      %24 = vector.extract_strided_slice %22 {offsets = [0, 0], sizes = [8, 64], strides = [1, 1]} : vector<8x96xf32> to vector<8x64xf32>
      %25 = arith.addf %23, %24 : vector<8x64xf32>
      %26 = arith.negf %25 : vector<8x64xf32>
      %27 = math.exp %26 : vector<8x64xf32>
      %cst_23 = arith.constant 1.000000e+00 : f32
      %28 = vector.broadcast %cst_23 : f32 to vector<8x64xf32>
      %29 = arith.addf %28, %27 : vector<8x64xf32>
      %30 = arith.divf %28, %29 : vector<8x64xf32>
      %31 = vector.extract_strided_slice %30 {offsets = [0, 32], sizes = [8, 32], strides = [1, 1]} : vector<8x64xf32> to vector<8x32xf32>
      %32 = vector.extract_strided_slice %19 {offsets = [0, 64], sizes = [8, 32], strides = [1, 1]} : vector<8x96xf32> to vector<8x32xf32>
      %33 = vector.extract_strided_slice %30 {offsets = [0, 0], sizes = [8, 32], strides = [1, 1]} : vector<8x64xf32> to vector<8x32xf32>
      %34 = vector.extract_strided_slice %22 {offsets = [0, 64], sizes = [8, 32], strides = [1, 1]} : vector<8x96xf32> to vector<8x32xf32>
      %35 = arith.mulf %33, %34 : vector<8x32xf32>
      %36 = arith.addf %32, %35 : vector<8x32xf32>
      %37 = math.tanh %36 : vector<8x32xf32>
      %cst_24 = arith.constant 1.000000e+00 : f32
      %38 = vector.broadcast %cst_24 : f32 to vector<8x32xf32>
      %39 = arith.subf %38, %31 : vector<8x32xf32>
      %40 = arith.mulf %39, %37 : vector<8x32xf32>
      %41 = arith.mulf %31, %16 : vector<8x32xf32>
      %42 = arith.addf %40, %41 : vector<8x32xf32>
      %43 = vector.broadcast %15 : i32 to vector<8x1xi32>
      %44 = arith.cmpi sgt, %2, %43 : vector<8x1xi32>
      %45 = vector.shape_cast %44 : vector<8x1xi1> to vector<8x1xi1>
      %46 = vector.broadcast %45 : vector<8x1xi1> to vector<8x32xi1>
      %47 = arith.select %46, %42, %16 : vector<8x32xi1>, vector<8x32xf32>
      %c0_25 = arith.constant 0 : index
      %c0_26 = arith.constant 0 : index
      %48 = vector.load %arg7[%c0_25, %c0_26] : memref<8x32xf32, #tpu.memory_space<vmem>>, vector<8x32xf32>
      tpu.vector_store %arg7[%c0_25, %c0_26], %47 {strides = array<i32>} : memref<8x32xf32, #tpu.memory_space<vmem>>, vector<8x32xf32>,
    }
    %c0_14 = arith.constant 0 : index
    %c0_15 = arith.constant 0 : index
    %12 = vector.load %arg7[%c0_14, %c0_15] : memref<8x32xf32, #tpu.memory_space<vmem>>, vector<8x32xf32>
    %c0_16 = arith.constant 0 : index
    %c0_17 = arith.constant 0 : index
    %13 = vector.load %arg6[%c0_16, %c0_17] : memref<8x32xf32, #tpu.memory_space<vmem>>, vector<8x32xf32>
    tpu.vector_store %arg6[%c0_16, %c0_17], %12 {strides = array<i32>} : memref<8x32xf32, #tpu.memory_space<vmem>>, vector<8x32xf32>,
    return
  }
  func.func @transform_0(%arg0: i32, %arg1: memref<1xi32, #tpu.memory_space<smem>>) -> (i32, i32) {
    %c0_i32 = arith.constant 0 : i32
    %c0_i32_0 = arith.constant 0 : i32
    %c0_i32_1 = arith.constant 0 : i32
    return %c0_i32, %c0_i32_0 : i32, i32
  }
  func.func @transform_1(%arg0: i32, %arg1: memref<1xi32, #tpu.memory_space<smem>>) -> (i32, i32, i32) {
    %c0_i32 = arith.constant 0 : i32
    %c0_i32_0 = arith.constant 0 : i32
    %c0_i32_1 = arith.constant 0 : i32
    %c0_i32_2 = arith.constant 0 : i32
    return %c0_i32, %c0_i32_0, %c0_i32_1 : i32, i32, i32
  }
  func.func @transform_2(%arg0: i32, %arg1: memref<1xi32, #tpu.memory_space<smem>>) -> (i32, i32) {
    %c0_i32 = arith.constant 0 : i32
    %c0_i32_0 = arith.constant 0 : i32
    %c0_i32_1 = arith.constant 0 : i32
    return %c0_i32, %c0_i32_0 : i32, i32
  }
  func.func @transform_3(%arg0: i32, %arg1: memref<1xi32, #tpu.memory_space<smem>>) -> (i32, i32) {
    %c0_i32 = arith.constant 0 : i32
    %c0_i32_0 = arith.constant 0 : i32
    %c0_i32_1 = arith.constant 0 : i32
    return %c0_i32, %c0_i32_0 : i32, i32
  }
  func.func @transform_4(%arg0: i32, %arg1: memref<1xi32, #tpu.memory_space<smem>>) -> (i32, i32) {
    %c0_i32 = arith.constant 0 : i32
    %c0_i32_0 = arith.constant 0 : i32
    %c0_i32_1 = arith.constant 0 : i32
    return %c0_i32, %c0_i32_0 : i32, i32
  }
}

module attributes {stable_mosaic.version = 11 : i64} {
  func.func @_decoder_kernel(%arg0: i32, %arg1: memref<1xi32, #tpu.memory_space<smem>>, %arg2: memref<8x1xi32, #tpu.memory_space<vmem>>, %arg3: memref<8x32xf32, #tpu.memory_space<vmem>>, %arg4: memref<8x8x96xf32, #tpu.memory_space<vmem>>, %arg5: memref<32x96xf32, #tpu.memory_space<vmem>>, %arg6: memref<1x96xf32, #tpu.memory_space<vmem>>, %arg7: memref<8x8x32xf32, #tpu.memory_space<vmem>>, %arg8: memref<8x32xf32, #tpu.memory_space<vmem>>) attributes {dimension_semantics = [#tpu.dimension_semantics<arbitrary>], iteration_bounds = array<i64: 1>, scalar_prefetch = 1 : i64, scratch_operands = 1 : i64, tpu.core_type = #tpu.core_type<tc>, window_params = [{pipeline_mode = #tpu.pipeline_mode<synchronous>, transform_indices = @transform_0, window_bounds = array<i64: 8, 1>}, {pipeline_mode = #tpu.pipeline_mode<synchronous>, transform_indices = @transform_1, window_bounds = array<i64: 8, 32>}, {pipeline_mode = #tpu.pipeline_mode<synchronous>, transform_indices = @transform_2, window_bounds = array<i64: 8, 8, 96>}, {pipeline_mode = #tpu.pipeline_mode<synchronous>, transform_indices = @transform_3, window_bounds = array<i64: 32, 96>}, {pipeline_mode = #tpu.pipeline_mode<synchronous>, transform_indices = @transform_4, window_bounds = array<i64: 1, 96>}, {pipeline_mode = #tpu.pipeline_mode<synchronous>, transform_indices = @transform_5, window_bounds = array<i64: 8, 8, 32>}]} {
    %c0 = arith.constant 0 : index
    %c0_0 = arith.constant 0 : index
    %0 = vector.load %arg5[%c0, %c0_0] : memref<32x96xf32, #tpu.memory_space<vmem>>, vector<32x96xf32>
    %c0_1 = arith.constant 0 : index
    %c0_2 = arith.constant 0 : index
    %1 = vector.load %arg6[%c0_1, %c0_2] : memref<1x96xf32, #tpu.memory_space<vmem>>, vector<1x96xf32>
    %c0_3 = arith.constant 0 : index
    %c0_4 = arith.constant 0 : index
    %2 = vector.load %arg2[%c0_3, %c0_4] : memref<8x1xi32, #tpu.memory_space<vmem>>, vector<8x1xi32>
    %cst = arith.constant 0.000000e+00 : f32
    %3 = vector.broadcast %cst : f32 to vector<8x8x32xf32>
    %c0_5 = arith.constant 0 : index
    %c0_6 = arith.constant 0 : index
    %c0_7 = arith.constant 0 : index
    %4 = vector.load %arg7[%c0_5, %c0_6, %c0_7] : memref<8x8x32xf32, #tpu.memory_space<vmem>>, vector<8x8x32xf32>
    tpu.vector_store %arg7[%c0_5, %c0_6, %c0_7], %3 {strides = array<i32>} : memref<8x8x32xf32, #tpu.memory_space<vmem>>, vector<8x8x32xf32>,
    %c0_8 = arith.constant 0 : index
    %c0_9 = arith.constant 0 : index
    %5 = vector.load %arg3[%c0_8, %c0_9] : memref<8x32xf32, #tpu.memory_space<vmem>>, vector<8x32xf32>
    %c0_10 = arith.constant 0 : index
    %c0_11 = arith.constant 0 : index
    %6 = vector.load %arg8[%c0_10, %c0_11] : memref<8x32xf32, #tpu.memory_space<vmem>>, vector<8x32xf32>
    tpu.vector_store %arg8[%c0_10, %c0_11], %5 {strides = array<i32>} : memref<8x32xf32, #tpu.memory_space<vmem>>, vector<8x32xf32>,
    %c0_12 = arith.constant 0 : index
    %7 = memref.load %arg1[%c0_12] : memref<1xi32, #tpu.memory_space<smem>>
    %c0_i32 = arith.constant 0 : i32
    %8 = arith.subi %7, %c0_i32 : i32
    %c1_i32 = arith.constant 1 : i32
    %c1_i32_13 = arith.constant 1 : i32
    %9 = arith.subi %c1_i32, %c1_i32_13 : i32
    %10 = arith.addi %8, %9 : i32
    %c1_i32_14 = arith.constant 1 : i32
    %11 = arith.divsi %10, %c1_i32_14 : i32
    %c1_i32_15 = arith.constant 1 : i32
    %c0_i32_16 = arith.constant 0 : i32
    %c0_i32_17 = arith.constant 0 : i32
    %12 = arith.subi %11, %c0_i32_17 : i32
    %13 = arith.addi %c0_i32_17, %12 : i32
    %c1_i32_18 = arith.constant 1 : i32
    scf.for %arg9 = %c0_i32_17 to %13 step %c1_i32_18  : i32 {
      %14 = arith.muli %arg9, %c1_i32_15 : i32
      %15 = arith.addi %c0_i32_16, %14 : i32
      %c0_19 = arith.constant 0 : index
      %c0_20 = arith.constant 0 : index
      %16 = vector.load %arg8[%c0_19, %c0_20] : memref<8x32xf32, #tpu.memory_space<vmem>>, vector<8x32xf32>
      %17 = arith.index_cast %15 : i32 to index
      %c0_21 = arith.constant 0 : index
      %c0_22 = arith.constant 0 : index
      %18 = vector.load %arg4[%17, %c0_21, %c0_22] : memref<8x8x96xf32, #tpu.memory_space<vmem>>, vector<1x8x96xf32>
      %19 = vector.shape_cast %18 : vector<1x8x96xf32> to vector<8x96xf32>
      %cst_23 = arith.constant dense<0.000000e+00> : vector<8x96xf32>
      %20 = tpu.matmul %16, %0, %cst_23 {dimension_numbers = #tpu.dot_dimension_numbers<[1], [0], [0], [1], [0, 0, 1, 1], [], []>} : vector<8x32xf32>, vector<32x96xf32>, vector<8x96xf32> -> vector<8x96xf32>
      %21 = vector.broadcast %1 : vector<1x96xf32> to vector<8x96xf32>
      %22 = arith.addf %20, %21 : vector<8x96xf32>
      %23 = vector.extract_strided_slice %19 {offsets = [0, 0], sizes = [8, 64], strides = [1, 1]} : vector<8x96xf32> to vector<8x64xf32>
      %24 = vector.extract_strided_slice %22 {offsets = [0, 0], sizes = [8, 64], strides = [1, 1]} : vector<8x96xf32> to vector<8x64xf32>
      %25 = arith.addf %23, %24 : vector<8x64xf32>
      %26 = arith.negf %25 : vector<8x64xf32>
      %27 = math.exp %26 : vector<8x64xf32>
      %cst_24 = arith.constant 1.000000e+00 : f32
      %28 = vector.broadcast %cst_24 : f32 to vector<8x64xf32>
      %29 = arith.addf %28, %27 : vector<8x64xf32>
      %30 = arith.divf %28, %29 : vector<8x64xf32>
      %31 = vector.extract_strided_slice %30 {offsets = [0, 32], sizes = [8, 32], strides = [1, 1]} : vector<8x64xf32> to vector<8x32xf32>
      %32 = vector.extract_strided_slice %19 {offsets = [0, 64], sizes = [8, 32], strides = [1, 1]} : vector<8x96xf32> to vector<8x32xf32>
      %33 = vector.extract_strided_slice %30 {offsets = [0, 0], sizes = [8, 32], strides = [1, 1]} : vector<8x64xf32> to vector<8x32xf32>
      %34 = vector.extract_strided_slice %22 {offsets = [0, 64], sizes = [8, 32], strides = [1, 1]} : vector<8x96xf32> to vector<8x32xf32>
      %35 = arith.mulf %33, %34 : vector<8x32xf32>
      %36 = arith.addf %32, %35 : vector<8x32xf32>
      %37 = math.tanh %36 : vector<8x32xf32>
      %cst_25 = arith.constant 1.000000e+00 : f32
      %38 = vector.broadcast %cst_25 : f32 to vector<8x32xf32>
      %39 = arith.subf %38, %31 : vector<8x32xf32>
      %40 = arith.mulf %39, %37 : vector<8x32xf32>
      %41 = arith.mulf %31, %16 : vector<8x32xf32>
      %42 = arith.addf %40, %41 : vector<8x32xf32>
      %43 = vector.broadcast %15 : i32 to vector<8x1xi32>
      %44 = arith.cmpi sgt, %2, %43 : vector<8x1xi32>
      %cst_26 = arith.constant 0.000000e+00 : f32
      %45 = vector.shape_cast %44 : vector<8x1xi1> to vector<8x1xi1>
      %46 = vector.broadcast %45 : vector<8x1xi1> to vector<8x32xi1>
      %47 = vector.broadcast %cst_26 : f32 to vector<8x32xf32>
      %48 = arith.select %46, %42, %47 : vector<8x32xi1>, vector<8x32xf32>
      %49 = arith.index_cast %15 : i32 to index
      %c0_27 = arith.constant 0 : index
      %c0_28 = arith.constant 0 : index
      %50 = vector.load %arg7[%49, %c0_27, %c0_28] : memref<8x8x32xf32, #tpu.memory_space<vmem>>, vector<1x8x32xf32>
      %51 = vector.shape_cast %50 : vector<1x8x32xf32> to vector<8x32xf32>
      %52 = vector.shape_cast %48 : vector<8x32xf32> to vector<1x8x32xf32>
      tpu.vector_store %arg7[%49, %c0_27, %c0_28], %52 {strides = array<i32>} : memref<8x8x32xf32, #tpu.memory_space<vmem>>, vector<1x8x32xf32>,
      %53 = vector.shape_cast %44 : vector<8x1xi1> to vector<8x1xi1>
      %54 = vector.broadcast %53 : vector<8x1xi1> to vector<8x32xi1>
      %55 = arith.select %54, %42, %16 : vector<8x32xi1>, vector<8x32xf32>
      %c0_29 = arith.constant 0 : index
      %c0_30 = arith.constant 0 : index
      %56 = vector.load %arg8[%c0_29, %c0_30] : memref<8x32xf32, #tpu.memory_space<vmem>>, vector<8x32xf32>
      tpu.vector_store %arg8[%c0_29, %c0_30], %55 {strides = array<i32>} : memref<8x32xf32, #tpu.memory_space<vmem>>, vector<8x32xf32>,
    }
    return
  }
  func.func @transform_0(%arg0: i32, %arg1: memref<1xi32, #tpu.memory_space<smem>>) -> (i32, i32) {
    %c0_i32 = arith.constant 0 : i32
    %c0_i32_0 = arith.constant 0 : i32
    %c0_i32_1 = arith.constant 0 : i32
    return %c0_i32, %c0_i32_0 : i32, i32
  }
  func.func @transform_1(%arg0: i32, %arg1: memref<1xi32, #tpu.memory_space<smem>>) -> (i32, i32) {
    %c0_i32 = arith.constant 0 : i32
    %c0_i32_0 = arith.constant 0 : i32
    %c0_i32_1 = arith.constant 0 : i32
    return %c0_i32, %c0_i32_0 : i32, i32
  }
  func.func @transform_2(%arg0: i32, %arg1: memref<1xi32, #tpu.memory_space<smem>>) -> (i32, i32, i32) {
    %c0_i32 = arith.constant 0 : i32
    %c0_i32_0 = arith.constant 0 : i32
    %c0_i32_1 = arith.constant 0 : i32
    %c0_i32_2 = arith.constant 0 : i32
    return %c0_i32, %c0_i32_0, %c0_i32_1 : i32, i32, i32
  }
  func.func @transform_3(%arg0: i32, %arg1: memref<1xi32, #tpu.memory_space<smem>>) -> (i32, i32) {
    %c0_i32 = arith.constant 0 : i32
    %c0_i32_0 = arith.constant 0 : i32
    %c0_i32_1 = arith.constant 0 : i32
    return %c0_i32, %c0_i32_0 : i32, i32
  }
  func.func @transform_4(%arg0: i32, %arg1: memref<1xi32, #tpu.memory_space<smem>>) -> (i32, i32) {
    %c0_i32 = arith.constant 0 : i32
    %c0_i32_0 = arith.constant 0 : i32
    %c0_i32_1 = arith.constant 0 : i32
    return %c0_i32, %c0_i32_0 : i32, i32
  }
  func.func @transform_5(%arg0: i32, %arg1: memref<1xi32, #tpu.memory_space<smem>>) -> (i32, i32, i32) {
    %c0_i32 = arith.constant 0 : i32
    %c0_i32_0 = arith.constant 0 : i32
    %c0_i32_1 = arith.constant 0 : i32
    %c0_i32_2 = arith.constant 0 : i32
    return %c0_i32, %c0_i32_0, %c0_i32_1 : i32, i32, i32
  }
}

module attributes {stable_mosaic.version = 11 : i64} {
  func.func @_proj_kernel(%arg0: i32, %arg1: memref<64x32xf32, #tpu.memory_space<vmem>>, %arg2: memref<32x128xf32, #tpu.memory_space<vmem>>, %arg3: memref<1x128xf32, #tpu.memory_space<vmem>>, %arg4: memref<64x128xf32, #tpu.memory_space<vmem>>) attributes {dimension_semantics = [#tpu.dimension_semantics<parallel>], iteration_bounds = array<i64: 1>, scalar_prefetch = 0 : i64, scratch_operands = 0 : i64, tpu.core_type = #tpu.core_type<tc>, window_params = [{transform_indices = @transform_0, window_bounds = array<i64: 64, 32>}, {pipeline_mode = #tpu.pipeline_mode<synchronous>, transform_indices = @transform_1, window_bounds = array<i64: 32, 128>}, {pipeline_mode = #tpu.pipeline_mode<synchronous>, transform_indices = @transform_2, window_bounds = array<i64: 1, 128>}, {transform_indices = @transform_3, window_bounds = array<i64: 64, 128>}]} {
    %c0 = arith.constant 0 : index
    %c0_0 = arith.constant 0 : index
    %0 = vector.load %arg1[%c0, %c0_0] : memref<64x32xf32, #tpu.memory_space<vmem>>, vector<64x32xf32>
    %c0_1 = arith.constant 0 : index
    %c0_2 = arith.constant 0 : index
    %1 = vector.load %arg2[%c0_1, %c0_2] : memref<32x128xf32, #tpu.memory_space<vmem>>, vector<32x128xf32>
    %cst = arith.constant dense<0.000000e+00> : vector<64x128xf32>
    %2 = tpu.matmul %0, %1, %cst {dimension_numbers = #tpu.dot_dimension_numbers<[1], [0], [0], [1], [0, 0, 1, 1], [], []>} : vector<64x32xf32>, vector<32x128xf32>, vector<64x128xf32> -> vector<64x128xf32>
    %c0_3 = arith.constant 0 : index
    %c0_4 = arith.constant 0 : index
    %3 = vector.load %arg3[%c0_3, %c0_4] : memref<1x128xf32, #tpu.memory_space<vmem>>, vector<1x128xf32>
    %4 = vector.broadcast %3 : vector<1x128xf32> to vector<64x128xf32>
    %5 = arith.addf %2, %4 : vector<64x128xf32>
    %cst_5 = arith.constant dense<0xFF800000> : vector<64xf32>
    %6 = vector.multi_reduction <maximumf>, %5, %cst_5 [1] : vector<64x128xf32> to vector<64xf32>
    %cst_6 = arith.constant 0xFF800000 : f32
    %7 = vector.broadcast %cst_6 : f32 to vector<64xf32>
    %8 = arith.maximumf %7, %6 : vector<64xf32>
    %9 = vector.shape_cast %8 : vector<64xf32> to vector<64x1xf32>
    %10 = vector.broadcast %9 : vector<64x1xf32> to vector<64x128xf32>
    %11 = arith.subf %5, %10 : vector<64x128xf32>
    %12 = math.exp %11 : vector<64x128xf32>
    %cst_7 = arith.constant dense<0.000000e+00> : vector<64xf32>
    %13 = vector.multi_reduction <add>, %12, %cst_7 [1] : vector<64x128xf32> to vector<64xf32>
    %14 = vector.shape_cast %13 : vector<64xf32> to vector<64x1xf32>
    %15 = math.log %14 : vector<64x1xf32>
    %16 = vector.broadcast %15 : vector<64x1xf32> to vector<64x128xf32>
    %17 = arith.subf %11, %16 : vector<64x128xf32>
    %c0_8 = arith.constant 0 : index
    %c0_9 = arith.constant 0 : index
    %18 = vector.load %arg4[%c0_8, %c0_9] : memref<64x128xf32, #tpu.memory_space<vmem>>, vector<64x128xf32>
    tpu.vector_store %arg4[%c0_8, %c0_9], %17 {strides = array<i32>} : memref<64x128xf32, #tpu.memory_space<vmem>>, vector<64x128xf32>,
    return
  }
  func.func @transform_0(%arg0: i32) -> (i32, i32) {
    %c0_i32 = arith.constant 0 : i32
    %c0_i32_0 = arith.constant 0 : i32
    return %arg0, %c0_i32 : i32, i32
  }
  func.func @transform_1(%arg0: i32) -> (i32, i32) {
    %c0_i32 = arith.constant 0 : i32
    %c0_i32_0 = arith.constant 0 : i32
    %c0_i32_1 = arith.constant 0 : i32
    return %c0_i32, %c0_i32_0 : i32, i32
  }
  func.func @transform_2(%arg0: i32) -> (i32, i32) {
    %c0_i32 = arith.constant 0 : i32
    %c0_i32_0 = arith.constant 0 : i32
    %c0_i32_1 = arith.constant 0 : i32
    return %c0_i32, %c0_i32_0 : i32, i32
  }
  func.func @transform_3(%arg0: i32) -> (i32, i32) {
    %c0_i32 = arith.constant 0 : i32
    %c0_i32_0 = arith.constant 0 : i32
    return %arg0, %c0_i32 : i32, i32
  }
}

</mosaic_0001>

<bundles_post_ra>
// kernel: seq2seq_gru_forward.3
= control target key start
LH: loop header
LB: loop body
LE: loop exit
PB: predicated region body
PF: predicated region fallthrough
CT: control target
= control target key end

     0   :  { %vm25_vm0 = vcmask 261120   ;;  %v224_v3 = vmov 0.0   ;;  %s323_s0 = inlined_call_operand.<no memory space> [shape: s32[1], index: 0, kind: input, shape index: {}]   ;;  %s324_s1 = inlined_call_operand.vmem [shape: s32[8,1], index: 1, kind: input, shape index: {}]   ;;  %s325_s2 = inlined_call_operand.vmem [shape: f32[8,8,96], index: 2, kind: input, shape index: {}]   ;;  %s326_s3 = inlined_call_operand.vmem [shape: f32[32,96], index: 3, kind: input, shape index: {}]   ;;  %s327_s4 = inlined_call_operand.vmem [shape: f32[1,96], index: 4, kind: input, shape index: {}]   ;;  %s328_s5 = inlined_call_operand.vmem [shape: f32[8,32], index: 5, kind: output, shape index: {}]  }
   0x1   :  { %v264_v0 = vld [vmem:[%s326_s3] sm:$0xff]  ;;  %v269_v1 = vld [vmem:[%s326_s3 + $0x8] sm:$0xff]  ;;  %v274_v2 = vld [vmem:[%s326_s3 + $0x10] sm:$0xff]  ;;  %26 = vst.msk [vmem:[#allocation2] sm:$0xff] %vm25_vm0, %v224_v3  ;;  %p172_p0 = scmp.le.s32.totalorder %s323_s0, 0 }
   0x2   :  { %v280_v4 = vld [vmem:[%s326_s3 + $0x18] sm:$0xff]  ;;  %v285_v5 = vld [vmem:[%s327_s4] ss:$0 sm:$0xff]  ;;  %s295_s7 = smov (!%p172_p0), 0  }
   0x3   :  { %v290_v6 = vld [vmem:[%s324_s1] sm:$0xff]  ;;  %169 = sbr.rel (%p172_p0) target bundleno = 696 (0x2b8), region = 38 }
   0x8 LB: > { %v225_v7 = vmov 0.0   ;;  %vm226_vm1 = vmmov 0   ;;  %v34_v8 = vld [vmem:[#allocation2] sm:$0xff]  ;;  %s227_s1 = smov 64   ;;  %s173_s3 = sshll.u32 %s222_s7, 3  ;;  %v146_v17 = vstv %s222_s7  ;;  %v228_v18 = vmov 0   ;;  %s222_s7 = sphi %s295_s7, %s31_s7  }
   0x9   : > { %182 = vmatprep.subr.mxu0 %v225_v7  ;;  %190 = vmatprep.mubr.msk.f32.mxu0 %vm226_vm1, %v225_v7  ;;  %s36_s9 = scalar_lea.vmem %s325_s2, %s173_s3  ;;  %vm147_vm2 = vcmp.gt.s32.totalorder %v290_v6, %v146_v17  ;;  %s229_s10 = smov 32  }
   0xa   : > { %183 = vmatpush3.msra.mxu0 %v280_v4  ;;  %v37_v12 = vld [vmem:[%s36_s9] sm:$0xff]  ;;  %208 = vset.pattern.permute.xlu1 %v228_v18  ;;  %v148_v19 = vsel %vm147_vm2, 1, %v228_v18  ;;  %s230_s11 = smov 96   ;;  %s31_s7 = sadd.s32 1, %s222_s7  }
   0xb   : > { %184 = vmatprep.subr.mxu0 %v225_v7  ;;  %209 = vset.pattern.permute.xlu0 %v228_v18  ;;  %p30_p1 = scmp.ge.s32.totalorder %s31_s7, %s323_s0 }
   0xc   : > { %185 = vmatpush3.msra.mxu0 %v274_v2  ;;  %150 = vperm.xlu1 %208, %v148_v19  }
   0xd   : > { %186 = vmatprep.subr.mxu0 %v225_v7 }
   0xe   : > { %187 = vmatpush3.msra.mxu0 %v269_v1 }
   0xf   : > { %188 = vmatprep.subr.mxu0 %v225_v7 }
  0x10   : > { %189 = vmatpush3.msra.mxu0 %v264_v0 }
  0x11   : > { %191 = vmatmul.mubr.msk.f32.vlgmr.msra.gmra.mxu0 %vm25_vm0, %v34_v8 }
  0x87   : > { %v151_v26 = vpop.permute.xlu1 %150 }
  0x88   : > { %vm152_vm3 = vcmp.eq.s32.totalorder %v151_v26, 1 }
  0xd1   : > { %v113_v9 = vpop.f32.mrf.mxu0 }
  0xd2   : > { %v114_v10 = vadd.f32 %v285_v5, %v113_v9 }
  0xd3   : > { %v192_v11 = vpop.f32.mrf.mxu0 }
  0xd4   : > { %125 = vrot.lane.b32.xlu0 %v114_v10, %s227_s1  ;;  %v117_v13 = vadd.f32 %v114_v10, %v37_v12 }
  0xd6   : > { %v176_v14 = vmul.f32 -1.442695, %v117_v13 }
  0xd8   : > { %210 = vpow2.f32 %v176_v14 }
  0xe5   : > { %v211_v15 = vpop.eup %210 }
  0xe6   : > { %v121_v16 = vadd.f32 1.0, %v211_v15 }
  0xe8   : > { %212 = vrcp.f32 %v121_v16 }
  0xf5   : > { %v213_v20 = vpop.eup %212 }
  0xf6   : > { %v135_v28 = vsub.f32 1.0, %v213_v20 }
 0x146   : > { %v126_v21 = vpop.permute.xlu0 %125 }
 0x147   : > { %v128_v22 = vmul.f32 %v213_v20, %v126_v21 }
 0x149   : > { %130 = vrot.lane.b32.xlu0 %v128_v22, %s227_s1 }
 0x14d   : > { %141 = vrot.lane.b32.xlu0 %v34_v8, %s229_s10 }
 0x1bb   : > { %v131_v23 = vpop.permute.xlu0 %130 }
 0x1bc   : > { %v133_v24 = vadd.f32 %v131_v23, %v37_v12 }
 0x1be   : > { %214 = vtanh.f32 %v133_v24 }
 0x1bf   : > { %v142_v27 = vpop.permute.xlu0 %141 }
 0x1c0   : > { %v144_v30 = vmul.f32 %v213_v20, %v142_v27 }
 0x1cb   : > { %v215_v25 = vpop.eup %214 }
 0x1cc   : > { %137 = vrot.lane.b32.xlu1 %v215_v25, %s230_s11 }
 0x23e   : > { %v138_v29 = vpop.permute.xlu1 %137 }
 0x23f   : > { %v140_v31 = vmul.f32 %v138_v29, %v135_v28 }
 0x241   : > { %v145_v32 = vadd.f32 %v144_v30, %v140_v31 }
 0x243   : > { %v153_v33 = vsel %vm152_vm3, %v145_v32, %v142_v27 }
 0x244   : > { %155 = vrot.lane.b32.xlu1 %v153_v33, %s230_s11 }
 0x2b3   :  { %33 = sbr.rel (!%p30_p1) target bundleno = 8 (0x8), region = 44 }
 0x2b6   : > { %v156_v34 = vpop.permute.xlu1 %155 }
 0x2b7   : > { %158 = vst.msk [vmem:[#allocation2] sm:$0xff] %vm25_vm0, %v156_v34 }
 0x2b8 PF:  {}
 0x2be   :  { %v159_v35 = vld [vmem:[#allocation2] sm:$0xff] }
 0x2bf   :  { %160 = vst.msk [vmem:[%s328_s5] sm:$0xff] %vm25_vm0, %v159_v35 }

// kernel: seq2seq_gru_forward.5
= control target key start
LH: loop header
LB: loop body
LE: loop exit
PB: predicated region body
PF: predicated region fallthrough
CT: control target
= control target key end

     0   :  { %vm33_vm0 = vcmask 261120   ;;  %s459_s1 = inlined_call_operand.vmem [shape: f32[32,128], index: 1, kind: input, shape index: {}]   ;;  %s460_s0 = inlined_call_operand.vmem [shape: f32[64,32], index: 0, kind: input, shape index: {}]   ;;  %s461_s2 = inlined_call_operand.vmem [shape: f32[1,128], index: 2, kind: input, shape index: {}]   ;;  %s462_s3 = inlined_call_operand.vmem [shape: f32[64,128], index: 3, kind: output, shape index: {}]  }
   0x1   :  { %v25_v0 = vld [vmem:[%s459_s1 + $0x18] sm:$0xff]  ;;  %v24_v1 = vld [vmem:[%s459_s1 + $0x10] sm:$0xff]  ;;  %v23_v2 = vld [vmem:[%s459_s1 + $0x8] sm:$0xff] }
   0x2   :  { %276 = vmatprep.subr.mxu0 %v25_v0  ;;  %296 = vmatprep.subr.mxu1 %v25_v0  ;;  %v22_v3 = vld [vmem:[%s459_s1] sm:$0xff]  ;;  %v15_v6 = vld [vmem:[%s460_s0 + $0x8] sm:$0xff]  ;;  %v16_v8 = vld [vmem:[%s460_s0 + $0x10] sm:$0xff] }
   0x3   :  { %277 = vmatpush3.msra.mxu0 %v25_v0  ;;  %300 = vmatpush3.msra.mxu1 %v25_v0  ;;  %v14_v4 = vld [vmem:[%s460_s0] sm:$0xff]  ;;  %v19_v7 = vld [vmem:[%s460_s0 + $0x28] sm:$0xff]  ;;  %v20_v9 = vld [vmem:[%s460_s0 + $0x30] sm:$0xff] }
   0x4   :  { %278 = vmatprep.subr.mxu0 %v24_v1  ;;  %297 = vmatprep.subr.mxu1 %v24_v1  ;;  %v18_v5 = vld [vmem:[%s460_s0 + $0x20] sm:$0xff]  ;;  %v17_v10 = vld [vmem:[%s460_s0 + $0x18] sm:$0xff] }
   0x5   :  { %279 = vmatpush3.msra.mxu0 %v24_v1  ;;  %301 = vmatpush3.msra.mxu1 %v24_v1  ;;  %v21_v11 = vld [vmem:[%s460_s0 + $0x38] sm:$0xff]  ;;  %v255_v12 = vld [vmem:[%s461_s2] ss:$0 sm:$0xff] }
   0x6   :  { %280 = vmatprep.subr.mxu0 %v23_v2  ;;  %298 = vmatprep.subr.mxu1 %v23_v2 }
   0x7   :  { %281 = vmatpush3.msra.mxu0 %v23_v2  ;;  %302 = vmatpush3.msra.mxu1 %v23_v2 }
   0x8   :  { %282 = vmatprep.subr.mxu0 %v22_v3  ;;  %299 = vmatprep.subr.mxu1 %v22_v3 }
   0x9   :  { %283 = vmatpush3.msra.mxu0 %v22_v3  ;;  %303 = vmatpush3.msra.mxu1 %v22_v3 }
   0xa   :  { %284 = vmatprep.mubr.msk.f32.mxu0 %vm33_vm0, %v14_v4  ;;  %290 = vmatprep.mubr.msk.f32.mxu1 %vm33_vm0, %v18_v5 }
   0xb   :  { %285 = vmatmul.mubr.msk.f32.vlgmr.msra.gmra.mxu0 %vm33_vm0, %v15_v6  ;;  %291 = vmatmul.mubr.msk.f32.vlgmr.msra.gmra.mxu1 %vm33_vm0, %v19_v7 }
   0xc   :  { %287 = vmatprep.mubr.msk.f32.mxu0 %vm33_vm0, %v16_v8  ;;  %293 = vmatprep.mubr.msk.f32.mxu1 %vm33_vm0, %v20_v9 }
   0xf   :  { %288 = vmatmul.mubr.msk.f32.gmra.mxu0 %vm33_vm0, %v17_v10  ;;  %294 = vmatmul.mubr.msk.f32.gmra.mxu1 %vm33_vm0, %v21_v11 }
  0xcb   :  { %v286_v13 = vpop.f32.mrf.mxu0  ;;  %v292_v14 = vpop.f32.mrf.mxu1 }
  0xcc   :  { %v130_v15 = vadd.f32 %v286_v13, %v255_v12  ;;  %v150_v16 = vadd.f32 %v292_v14, %v255_v12 }
  0xcd   :  { %v124_v17 = vpop.f32.mrf.mxu0  ;;  %v144_v18 = vpop.f32.mrf.mxu1 }
  0xce   :  { %173 = vmax.xlane.f32.xlu1 %v150_v16  ;;  %165 = vmax.xlane.f32.xlu0 %v130_v15  ;;  %v125_v21 = vadd.f32 %v255_v12, %v124_v17  ;;  %v145_v26 = vadd.f32 %v255_v12, %v144_v18 }
  0xcf   :  { %v289_v19 = vpop.f32.mrf.mxu0  ;;  %v295_v20 = vpop.f32.mrf.mxu1 }
  0xd0   :  { %v140_v22 = vadd.f32 %v289_v19, %v255_v12  ;;  %v160_v27 = vadd.f32 %v295_v20, %v255_v12 }
  0xd1   :  { %v134_v23 = vpop.f32.mrf.mxu0  ;;  %v154_v25 = vpop.f32.mrf.mxu1 }
  0xd2   :  { %169 = vmax.xlane.f32.xlu1 %v140_v22  ;;  %163 = vmax.xlane.f32.xlu0 %v125_v21  ;;  %v135_v24 = vadd.f32 %v255_v12, %v134_v23  ;;  %v155_v28 = vadd.f32 %v255_v12, %v154_v25 }
  0xd6   :  { %167 = vmax.xlane.f32.xlu1 %v135_v24  ;;  %171 = vmax.xlane.f32.xlu0 %v145_v26 }
  0xda   :  { %177 = vmax.xlane.f32.xlu1 %v160_v27  ;;  %175 = vmax.xlane.f32.xlu0 %v155_v28 }
 0x157   :  { %v174_v29 = vpop.xlane.xlu1 %173  ;;  %v166_v30 = vpop.xlane.xlu0 %165 }
 0x158   :  { %v403_v31 = vsub.f32 %v150_v16, %v174_v29  ;;  %v405_v32 = vsub.f32 %v130_v15, %v166_v30 }
 0x15a   :  { %v189_v33 = vmul.f32 1.442695, %v405_v32  ;;  %v197_v36 = vmul.f32 1.442695, %v403_v31 }
 0x15b   :  { %v170_v34 = vpop.xlane.xlu1 %169  ;;  %v164_v35 = vpop.xlane.xlu0 %163 }
 0x15c   :  { %v409_v37 = vsub.f32 %v140_v22, %v170_v34  ;;  %v411_v38 = vsub.f32 %v125_v21, %v164_v35  ;;  %304 = vpow2.f32 %v189_v33 }
 0x15d   :  { %306 = vpow2.f32 %v197_v36 }
 0x15e   :  { %v187_v39 = vmul.f32 1.442695, %v411_v38  ;;  %v193_v42 = vmul.f32 1.442695, %v409_v37 }
 0x15f   :  { %v168_v40 = vpop.xlane.xlu1 %167  ;;  %v172_v41 = vpop.xlane.xlu0 %171 }
 0x160   :  { %v415_v43 = vsub.f32 %v145_v26, %v172_v41  ;;  %308 = vpow2.f32 %v187_v39  ;;  %v417_v44 = vsub.f32 %v135_v24, %v168_v40 }
 0x161   :  { %310 = vpow2.f32 %v193_v42 }
 0x162   :  { %v195_v45 = vmul.f32 1.442695, %v415_v43  ;;  %v191_v49 = vmul.f32 1.442695, %v417_v44 }
 0x163   :  { %v178_v46 = vpop.xlane.xlu1 %177  ;;  %v176_v47 = vpop.xlane.xlu0 %175 }
 0x164   :  { %v420_v48 = vsub.f32 %v160_v27, %v178_v46  ;;  %312 = vpow2.f32 %v195_v45  ;;  %v423_v50 = vsub.f32 %v155_v28, %v176_v47 }
 0x166   :  { %v201_v51 = vmul.f32 1.442695, %v420_v48  ;;  %v199_v52 = vmul.f32 1.442695, %v423_v50 }
 0x168   :  { %314 = vpow2.f32 %v201_v51 }
 0x169   :  { %316 = vpow2.f32 %v191_v49  ;;  %v305_v53 = vpop.eup %304 }
 0x16a   :  { %205 = vadd.xlane.f32.xlu1 %v305_v53  ;;  %v307_v54 = vpop.eup %306  ;;  %318 = vpow2.f32 %v199_v52 }
 0x16d   :  { %v309_v55 = vpop.eup %308 }
 0x16e   :  { %213 = vadd.xlane.f32.xlu1 %v307_v54  ;;  %203 = vadd.xlane.f32.xlu0 %v309_v55  ;;  %v311_v56 = vpop.eup %310 }
 0x171   :  { %v313_v57 = vpop.eup %312 }
 0x172   :  { %209 = vadd.xlane.f32.xlu1 %v311_v56  ;;  %211 = vadd.xlane.f32.xlu0 %v313_v57 }
 0x175   :  { %v315_v58 = vpop.eup %314 }
 0x176   :  { %v317_v59 = vpop.eup %316  ;;  %217 = vadd.xlane.f32.xlu1 %v315_v58 }
 0x177   :  { %207 = vadd.xlane.f32.xlu0 %v317_v59  ;;  %v319_v60 = vpop.eup %318 }
 0x17b   :  { %215 = vadd.xlane.f32.xlu0 %v319_v60 }
 0x1f3   :  { %v206_v61 = vpop.xlane.xlu1 %205 }
 0x1f4   :  { %320 = vlog2.f32 %v206_v61 }
 0x1f7   :  { %v214_v62 = vpop.xlane.xlu1 %213  ;;  %v204_v63 = vpop.xlane.xlu0 %203 }
 0x1f8   :  { %322 = vlog2.f32 %v214_v62 }
 0x1f9   :  { %324 = vlog2.f32 %v204_v63 }
 0x1fb   :  { %v210_v0 = vpop.xlane.xlu1 %209  ;;  %v212_v1 = vpop.xlane.xlu0 %211 }
 0x1fc   :  { %326 = vlog2.f32 %v210_v0 }
 0x1fd   :  { %328 = vlog2.f32 %v212_v1 }
 0x1ff   :  { %v218_v2 = vpop.xlane.xlu1 %217 }
 0x200   :  { %v208_v3 = vpop.xlane.xlu0 %207  ;;  %330 = vlog2.f32 %v218_v2 }
 0x201   :  { %v321_v4 = vpop.eup %320  ;;  %332 = vlog2.f32 %v208_v3 }
 0x202   :  { %v222_v5 = vmul.f32 0.6931472, %v321_v4 }
 0x204   :  { %v216_v6 = vpop.xlane.xlu0 %215  ;;  %v236_v7 = vsub.f32 %v405_v32, %v222_v5 }
 0x205   :  { %334 = vlog2.f32 %v216_v6  ;;  %v323_v8 = vpop.eup %322 }
 0x206   :  { %v325_v9 = vpop.eup %324  ;;  %244 = vst [vmem:[%s462_s3 + $0x8] sm:$0xff] %v236_v7  ;;  %v230_v10 = vmul.f32 0.6931472, %v323_v8 }
 0x207   :  { %v220_v11 = vmul.f32 0.6931472, %v325_v9 }
 0x208   :  { %v240_v12 = vsub.f32 %v403_v31, %v230_v10 }
 0x209   :  { %v327_v13 = vpop.eup %326  ;;  %v235_v14 = vsub.f32 %v411_v38, %v220_v11 }
 0x20a   :  { %v329_v15 = vpop.eup %328  ;;  %248 = vst [vmem:[%s462_s3 + $0x28] sm:$0xff] %v240_v12  ;;  %v226_v16 = vmul.f32 0.6931472, %v327_v13 }
 0x20b   :  { %243 = vst [vmem:[%s462_s3] sm:$0xff] %v235_v14  ;;  %v228_v17 = vmul.f32 0.6931472, %v329_v15 }
 0x20c   :  { %v238_v18 = vsub.f32 %v409_v37, %v226_v16 }
 0x20d   :  { %v331_v19 = vpop.eup %330  ;;  %v239_v20 = vsub.f32 %v415_v43, %v228_v17 }
 0x20e   :  { %v333_v21 = vpop.eup %332  ;;  %246 = vst [vmem:[%s462_s3 + $0x18] sm:$0xff] %v238_v18  ;;  %v234_v22 = vmul.f32 0.6931472, %v331_v19 }
 0x20f   :  { %247 = vst [vmem:[%s462_s3 + $0x20] sm:$0xff] %v239_v20  ;;  %v224_v23 = vmul.f32 0.6931472, %v333_v21 }
 0x210   :  { %v242_v24 = vsub.f32 %v420_v48, %v234_v22 }
 0x211   :  { %v237_v26 = vsub.f32 %v417_v44, %v224_v23 }
 0x212   :  { %v335_v25 = vpop.eup %334  ;;  %250 = vst [vmem:[%s462_s3 + $0x38] sm:$0xff] %v242_v24 }
 0x213   :  { %v232_v27 = vmul.f32 0.6931472, %v335_v25  ;;  %245 = vst [vmem:[%s462_s3 + $0x10] sm:$0xff] %v237_v26 }
 0x215   :  { %v241_v28 = vsub.f32 %v423_v50, %v232_v27 }
 0x217   :  { %249 = vst [vmem:[%s462_s3 + $0x30] sm:$0xff] %v241_v28 }

// kernel: seq2seq_gru_forward.4
= control target key start
LH: loop header
LB: loop body
LE: loop exit
PB: predicated region body
PF: predicated region fallthrough
CT: control target
= control target key end

     0   :  { %vm28_vm0 = vcmask 261120   ;;  %v243_v3 = vmov 0.0   ;;  %s386_s0 = inlined_call_operand.<no memory space> [shape: s32[1], index: 0, kind: input, shape index: {}]   ;;  %s387_s1 = inlined_call_operand.vmem [shape: s32[8,1], index: 1, kind: input, shape index: {}]   ;;  %s388_s3 = inlined_call_operand.vmem [shape: f32[8,8,96], index: 3, kind: input, shape index: {}]   ;;  %s389_s4 = inlined_call_operand.vmem [shape: f32[32,96], index: 4, kind: input, shape index: {}]   ;;  %s390_s5 = inlined_call_operand.vmem [shape: f32[1,96], index: 5, kind: input, shape index: {}]   ;;  %s391_s6 = inlined_call_operand.vmem [shape: f32[8,8,32], index: 6, kind: output, shape index: {}]   ;;  %s392_s2 = inlined_call_operand.vmem [shape: f32[8,32], index: 2, kind: input, shape index: {}]  }
   0x1   :  { %v288_v0 = vld [vmem:[%s389_s4] sm:$0xff]  ;;  %v293_v1 = vld [vmem:[%s389_s4 + $0x8] sm:$0xff]  ;;  %v298_v2 = vld [vmem:[%s389_s4 + $0x10] sm:$0xff]  ;;  %29 = vst.msk [vmem:[%s391_s6] sm:$0xff] %vm28_vm0, %v243_v3  ;;  %p191_p0 = scmp.le.s32.totalorder %s386_s0, 0 }
   0x2   :  { %30 = vst.msk [vmem:[%s391_s6 + $0x8] sm:$0xff] %vm28_vm0, %v243_v3  ;;  %31 = vst.msk [vmem:[%s391_s6 + $0x10] sm:$0xff] %vm28_vm0, %v243_v3  ;;  %v335_v4 = vld [vmem:[%s389_s4 + $0x18] sm:$0xff]  ;;  %v340_v5 = vld [vmem:[%s390_s5] ss:$0 sm:$0xff]  ;;  %s354_s4 = smov (!%p191_p0), 0  }
   0x3   :  { %32 = vst.msk [vmem:[%s391_s6 + $0x18] sm:$0xff] %vm28_vm0, %v243_v3  ;;  %33 = vst.msk [vmem:[%s391_s6 + $0x20] sm:$0xff] %vm28_vm0, %v243_v3  ;;  %v345_v6 = vld [vmem:[%s387_s1] sm:$0xff]  ;;  %188 = sbr.rel (%p191_p0) target bundleno = 696 (0x2b8), region = 43 }
   0x4   :  { %34 = vst.msk [vmem:[%s391_s6 + $0x28] sm:$0xff] %vm28_vm0, %v243_v3  ;;  %35 = vst.msk [vmem:[%s391_s6 + $0x30] sm:$0xff] %vm28_vm0, %v243_v3  ;;  %v37_v7 = vld [vmem:[%s392_s2] sm:$0xff] }
   0x5   :  { %36 = vst.msk [vmem:[%s391_s6 + $0x38] sm:$0xff] %vm28_vm0, %v243_v3  ;;  %38 = vst.msk [vmem:[#allocation2] sm:$0xff] %vm28_vm0, %v37_v7 }
   0x8 LB: > { %v244_v8 = vmov 0.0   ;;  %vm245_vm1 = vmmov 0   ;;  %s246_s1 = smov 64   ;;  %s192_s2 = sshll.u32 %s241_s4, 3  ;;  %v158_v18 = vstv %s241_s4  ;;  %v247_v19 = vmov 0   ;;  %s241_s4 = sphi %s354_s4, %s43_s4  }
   0x9   : > { %201 = vmatprep.subr.mxu0 %v244_v8  ;;  %209 = vmatprep.mubr.msk.f32.mxu0 %vm245_vm1, %v244_v8  ;;  %s48_s30 = scalar_lea.vmem %s388_s3, %s192_s2  ;;  %vm159_vm2 = vcmp.gt.s32.totalorder %v345_v6, %v158_v18  ;;  %s248_s7 = smov 32  }
   0xa   : > { %202 = vmatpush3.msra.mxu0 %v335_v4  ;;  %v49_v13 = vld [vmem:[%s48_s30] sm:$0xff]  ;;  %227 = vset.pattern.permute.xlu1 %v247_v19  ;;  %v160_v20 = vsel %vm159_vm2, 1, %v247_v19  ;;  %s249_s8 = smov 96   ;;  %s170_s11 = scalar_lea.vmem %s391_s6, %s192_s2 }
   0xb   : > { %203 = vmatprep.subr.mxu0 %v244_v8  ;;  %228 = vset.pattern.permute.xlu0 %v247_v19  ;;  %s43_s4 = sadd.s32 1, %s241_s4  }
   0xc   : > { %204 = vmatpush3.msra.mxu0 %v298_v2  ;;  %v46_v9 = vld [vmem:[#allocation2] sm:$0xff]  ;;  %162 = vperm.xlu1 %227, %v160_v20   ;;  %p42_p1 = scmp.ge.s32.totalorder %s43_s4, %s386_s0 }
   0xd   : > { %205 = vmatprep.subr.mxu0 %v244_v8 }
   0xe   : > { %206 = vmatpush3.msra.mxu0 %v293_v1 }
   0xf   : > { %207 = vmatprep.subr.mxu0 %v244_v8 }
  0x10   : > { %208 = vmatpush3.msra.mxu0 %v288_v0 }
  0x11   : > { %210 = vmatmul.mubr.msk.f32.vlgmr.msra.gmra.mxu0 %vm28_vm0, %v46_v9 }
  0x87   : > { %v163_v27 = vpop.permute.xlu1 %162 }
  0x88   : > { %vm164_vm3 = vcmp.eq.s32.totalorder %v163_v27, 1 }
  0xd1   : > { %v125_v10 = vpop.f32.mrf.mxu0 }
  0xd2   : > { %v126_v11 = vadd.f32 %v340_v5, %v125_v10 }
  0xd3   : > { %v211_v12 = vpop.f32.mrf.mxu0 }
  0xd4   : > { %137 = vrot.lane.b32.xlu0 %v126_v11, %s246_s1  ;;  %v129_v14 = vadd.f32 %v126_v11, %v49_v13 }
  0xd6   : > { %v195_v15 = vmul.f32 -1.442695, %v129_v14 }
  0xd8   : > { %229 = vpow2.f32 %v195_v15 }
  0xe5   : > { %v230_v16 = vpop.eup %229 }
  0xe6   : > { %v133_v17 = vadd.f32 1.0, %v230_v16 }
  0xe8   : > { %231 = vrcp.f32 %v133_v17 }
  0xf5   : > { %v232_v21 = vpop.eup %231 }
  0xf6   : > { %v147_v29 = vsub.f32 1.0, %v232_v21 }
 0x146   : > { %v138_v22 = vpop.permute.xlu0 %137 }
 0x147   : > { %v140_v23 = vmul.f32 %v232_v21, %v138_v22 }
 0x149   : > { %142 = vrot.lane.b32.xlu0 %v140_v23, %s246_s1 }
 0x14d   : > { %153 = vrot.lane.b32.xlu0 %v46_v9, %s248_s7 }
 0x1bb   : > { %v143_v24 = vpop.permute.xlu0 %142 }
 0x1bc   : > { %v145_v25 = vadd.f32 %v143_v24, %v49_v13 }
 0x1be   : > { %233 = vtanh.f32 %v145_v25 }
 0x1bf   : > { %v154_v28 = vpop.permute.xlu0 %153 }
 0x1c0   : > { %v156_v31 = vmul.f32 %v232_v21, %v154_v28 }
 0x1cb   : > { %v234_v26 = vpop.eup %233 }
 0x1cc   : > { %149 = vrot.lane.b32.xlu1 %v234_v26, %s249_s8 }
 0x23e   : > { %v150_v30 = vpop.permute.xlu1 %149 }
 0x23f   : > { %v152_v32 = vmul.f32 %v150_v30, %v147_v29 }
 0x241   : > { %v157_v33 = vadd.f32 %v156_v31, %v152_v32 }
 0x243   : > { %v172_v34 = vsel %vm164_vm3, %v157_v33, %v154_v28  ;;  %v165_v35 = vsel %vm164_vm3, %v157_v33, 0.0 }
 0x244   : > { %174 = vrot.lane.b32.xlu0 %v172_v34, %s249_s8  ;;  %167 = vrot.lane.b32.xlu1 %v165_v35, %s249_s8 }
 0x2b3   :  { %45 = sbr.rel (!%p42_p1) target bundleno = 8 (0x8), region = 49 }
 0x2b6   : > { %v175_v36 = vpop.permute.xlu0 %174  ;;  %v168_v37 = vpop.permute.xlu1 %167 }
 0x2b7   : > { %177 = vst.msk [vmem:[#allocation2] sm:$0xff] %vm28_vm0, %v175_v36  ;;  %171 = vst.msk [vmem:[%s170_s11] sm:$0xff] %vm28_vm0, %v168_v37 }
 0x2b8 PF:  {}

</bundles_post_ra>
